<compile_context>
chip_gen: v7x
topology: tpu7x:2x2x1
jax: 0.10.0
libtpu: 0.0.40
codegen_flags: <defaults>
</compile_context>

<pallas_src>
import functools
from typing import NamedTuple

import numpy as np
import jax
import jax.numpy as jnp
from jax.experimental import pallas as pl
from jax.experimental.pallas import tpu as pltpu


CAP = 512  # row-tile cap (raised from 256 per perf review)


# ----------------------------------------------------------------------------
# small helpers
# ----------------------------------------------------------------------------
def _round_up(v, m):
    return (v + m - 1) // m * m


def _split(total, cap):
    """Split `total` rows into n blocks of size t (t multiple of 8, t*n>=total)."""
    n = max(1, -(-total // cap))
    t = _round_up(-(-total // n), 8)
    return t, n, t * n


class Act(NamedTuple):
    """Channel-padded, row-flattened bf16 activation.

    data[b, h*Ww + w, c] holds pixel (h, w), channel c for h < H, w < W,
    c < cout.  Columns w >= W (wide layout), rows >= H*Ww (tile padding) and
    channels >= cout (lane padding) may hold garbage; consumers either ignore
    them (1x1 convs, fused residual) or slice them off (act_to_nhwc).
    """
    data: jax.Array
    H: int
    W: int
    Ww: int
    cout: int


# ----------------------------------------------------------------------------
# Pallas conv kernel: one grid step computes a (tm, tn) output tile as a sum
# over the k*k taps of  A_tap @ W_tap,  where A_tap is a shifted row-window of
# the flat padded bf16 input.  Taps accumulate in a local f32 value (single
# store); the epilogue fuses bias, optional residual add and ReLU, stores bf16.
# ----------------------------------------------------------------------------
def _conv_kernel(x_ref, w_ref, b_ref, *rest, k, Ww, tm, taps, relu, has_res):
    if has_res:
        res_ref, o_ref = rest
    else:
        (o_ref,) = rest
        res_ref = None

    m = pl.program_id(2)
    base = pl.multiple_of(m * tm, 8)

    acc = None
    for t in range(taps):                      # static unroll (<= 9 taps)
        off = (t // k) * Ww + (t % k)
        a = x_ref[0, pl.ds(base + off, tm), :]
        contrib = jnp.dot(a, w_ref[t], preferred_element_type=jnp.float32)
        acc = contrib if acc is None else acc + contrib

    r = acc + b_ref[...]
    if has_res:
        r = r + res_ref[0].astype(jnp.float32)
    if relu:
        r = jnp.maximum(r, 0.0)
    o_ref[0] = r.astype(o_ref.dtype)


def _conv_pallas(x_flat, w, bias, res, *, k, Ww, tm, n_m, Mo_pad, relu):
    B, Mi_full, Cinp = x_flat.shape
    taps, _, Coutp = w.shape
    assert Cinp % 128 == 0 and Coutp % 128 == 0
    tn = 256 if Coutp % 256 == 0 else 128      # use the 256-wide MXU on v6e/v7x
    n_j = Coutp // tn
    has_res = res is not None

    in_specs = [
        pl.BlockSpec((1, Mi_full, Cinp), lambda b, j, m: (b, 0, 0)),
        pl.BlockSpec((taps, Cinp, tn), lambda b, j, m: (0, 0, j)),
        pl.BlockSpec((1, tn), lambda b, j, m: (0, j)),
    ]
    args = [x_flat, w, bias]
    if has_res:
        in_specs.append(pl.BlockSpec((1, tm, tn), lambda b, j, m: (b, m, j)))
        args.append(res)

    flops = 2 * B * n_m * tm * taps * Cinp * Coutp
    bytes_accessed = (B * Mi_full * Cinp * 2 + int(w.size) * 2
                      + B * Mo_pad * Coutp * (4 if has_res else 2)
                      + int(bias.size) * 4)

    # per-call scoped-VMEM budget: double-buffered blocks + f32 temporaries
    vmem = 2 * (Mi_full * Cinp * 2 + taps * Cinp * tn * 2
                + tm * tn * 2 * (2 if has_res else 1) + tn * 4)
    vmem += 4 * tm * tn * 4
    vmem_limit = int(max(32 * 1024 * 1024, vmem + (2 << 20)))

    out = pl.pallas_call(
        functools.partial(_conv_kernel, k=k, Ww=Ww, tm=tm, taps=taps,
                          relu=relu, has_res=has_res),
        out_shape=jax.ShapeDtypeStruct((B, Mo_pad, Coutp), jnp.bfloat16),
        grid=(B, n_j, n_m),
        in_specs=in_specs,
        out_specs=pl.BlockSpec((1, tm, tn), lambda b, j, m: (b, m, j)),
        compiler_params=pltpu.CompilerParams(
            dimension_semantics=("parallel", "parallel", "parallel"),
            vmem_limit_bytes=vmem_limit),
        cost_estimate=pl.CostEstimate(flops=flops, transcendentals=0,
                                      bytes_accessed=bytes_accessed),
    )(*args)
    return out


# ----------------------------------------------------------------------------
# Act <-> NHWC glue (jitted so pad/slice/cast fuse into single XLA passes)
# ----------------------------------------------------------------------------
@functools.partial(jax.jit, static_argnames=("H", "W", "Ww", "cout"))
def _act_slice_jit(data, *, H, W, Ww, cout):
    B = data.shape[0]
    return data[:, :H * Ww, :cout].reshape(B, H, Ww, cout)[:, :, :W, :]


def act_to_nhwc(a):
    return _act_slice_jit(a.data, H=a.H, W=a.W, Ww=a.Ww, cout=a.cout)


@functools.partial(jax.jit, static_argnames=("cp",))
def _flat_pad_jit(x, *, cp):
    B, H, W, C = x.shape
    d = jnp.pad(x.astype(jnp.bfloat16), ((0, 0), (0, 0), (0, 0), (0, cp - C)))
    Mo = H * W
    _, _, Mo_pad = _split(Mo, CAP)
    d = d.reshape(B, Mo, cp)
    if Mo_pad > Mo:
        d = jnp.pad(d, ((0, 0), (0, Mo_pad - Mo), (0, 0)))
    return d


def act_from_nhwc(x):
    B, H, W, C = x.shape
    cp = _round_up(C, 128)
    return Act(_flat_pad_jit(x, cp=cp), H, W, W, C)


@functools.partial(jax.jit, static_argnames=("Ww", "Mo_pad", "coutp"))
def _res_pad_jit(r, *, Ww, Mo_pad, coutp):
    B, H, W, C = r.shape
    r = jnp.pad(r.astype(jnp.bfloat16),
                ((0, 0), (0, 0), (0, Ww - W), (0, coutp - C)))
    r = r.reshape(B, H * Ww, coutp)
    if Mo_pad > H * Ww:
        r = jnp.pad(r, ((0, 0), (0, Mo_pad - H * Ww), (0, 0)))
    return r


def _res_match(res, x, coutp):
    """Return residual data matching the geometry of the 1x1 conv on `x`."""
    _, _, Mo_pad = _split(x.H * x.Ww, CAP)
    d = res.data
    if (res.H == x.H and res.W == x.W and res.Ww == x.Ww
            and d.shape[1] == Mo_pad and d.shape[2] == coutp):
        return d
    return _res_pad_jit(act_to_nhwc(res), Ww=x.Ww, Mo_pad=Mo_pad, coutp=coutp)


# ----------------------------------------------------------------------------
# conv wrappers
# ----------------------------------------------------------------------------
@functools.partial(jax.jit, static_argnames=("H", "Ww", "relu"))
def _conv1x1_jit(data, w, bias, res_data, *, H, Ww, relu):
    """Stride-1 1x1 conv consuming the flat layout directly (zero glue)."""
    Mo = H * Ww
    tm, n_m, Mo_pad = _split(Mo, CAP)
    assert data.shape[1] == Mo_pad
    return _conv_pallas(data, w, bias, res_data, k=1, Ww=Ww, tm=tm, n_m=n_m,
                        Mo_pad=Mo_pad, relu=relu)


@functools.partial(jax.jit, static_argnames=("H", "W", "Ww_in", "relu"))
def _conv3x3_jit(data, w, bias, *, H, W, Ww_in, relu):
    """Stride-1 'same' 3x3 conv, direct tap-shift formulation."""
    B, _, Cp = data.shape
    k, pad = 3, 1
    x = data[:, :H * Ww_in, :].reshape(B, H, Ww_in, Cp)[:, :, :W, :]
    Ww = W + 2 * pad
    Mo = H * Ww
    tm, n_m, Mo_pad = _split(Mo, CAP)
    halo = (k - 1) * (Ww + 1)
    Mi_pad = Mo_pad + halo
    Hstd = H + 2 * pad
    extra_h = max(0, -(-(Mi_pad - Hstd * Ww) // Ww))
    xp = jnp.pad(x, ((0, 0), (pad, pad + extra_h), (pad, pad), (0, 0)))
    x_flat = xp.reshape(B, (Hstd + extra_h) * Ww, Cp)
    return _conv_pallas(x_flat, w, bias, None, k=k, Ww=Ww, tm=tm, n_m=n_m,
                        Mo_pad=Mo_pad, relu=relu)


@functools.partial(jax.jit, static_argnames=("relu", "stride", "k"))
def _conv_im2col_jit(x, w, bias, *, relu, stride, k):
    """Strided conv (7 calls total) via im2col patches + the same kernel."""
    B, H, W, C = x.shape
    _, Kp, Coutp = w.shape
    pad = k // 2
    Ho = (H + 2 * pad - k) // stride + 1
    Wo = (W + 2 * pad - k) // stride + 1

    xp = jnp.pad(x.astype(jnp.bfloat16),
                 ((0, 0), (pad, pad), (pad, pad), (0, 0)))
    cols = [xp[:, dy:dy + stride * Ho:stride, dx:dx + stride * Wo:stride, :]
            for dy in range(k) for dx in range(k)]
    patches = jnp.concatenate(cols, axis=-1) if k > 1 else cols[0]

    Mo = Ho * Wo
    tm, n_m, Mo_pad = _split(Mo, CAP)
    a = patches.reshape(B, Mo, k * k * C)
    a = jnp.pad(a, ((0, 0), (0, Mo_pad - Mo), (0, Kp - k * k * C)))
    return _conv_pallas(a, w, bias, None, k=1, Ww=Wo, tm=tm, n_m=n_m,
                        Mo_pad=Mo_pad, relu=relu)


def conv(x, p, relu, res=None, stride=1):
    """x: Act (or raw NHWC array for the im2col path); returns an Act."""
    if p["direct"]:
        assert stride == 1
        if not isinstance(x, Act):
            x = act_from_nhwc(x)
        assert x.cout == p["cin"], (x.cout, p["cin"])
        assert x.data.shape[-1] == p["w"].shape[1]
        if p["k"] == 1:
            coutp = p["w"].shape[2]
            res_data = None
            if res is not None:
                assert isinstance(res, Act) and res.cout == p["cout"]
                res_data = _res_match(res, x, coutp)
            data = _conv1x1_jit(x.data, p["w"], p["b"], res_data,
                                H=x.H, Ww=x.Ww, relu=relu)
            return Act(data, x.H, x.W, x.Ww, p["cout"])
        elif p["k"] == 3:
            assert res is None
            data = _conv3x3_jit(x.data, p["w"], p["b"],
                                H=x.H, W=x.W, Ww_in=x.Ww, relu=relu)
            return Act(data, x.H, x.W, x.W + 2, p["cout"])
        else:
            raise ValueError("unsupported direct kernel size")
    else:
        assert res is None
        xn = act_to_nhwc(x) if isinstance(x, Act) else x
        assert xn.shape[-1] == p["cin"]
        k = p["k"]
        pad = k // 2
        Ho = (xn.shape[1] + 2 * pad - k) // stride + 1
        Wo = (xn.shape[2] + 2 * pad - k) // stride + 1
        data = _conv_im2col_jit(xn, p["w"], p["b"], relu=relu,
                                stride=stride, k=k)
        return Act(data, Ho, Wo, Wo, p["cout"])


# ----------------------------------------------------------------------------
# maxpool 3x3 / stride 2 / pad 1 : separable, lane-dense Pallas max kernel
# ----------------------------------------------------------------------------
def _max_stack_kernel(x_ref, o_ref):
    o_ref[...] = jnp.max(x_ref[...], axis=0)


def _max_stack(arrs):
    n = len(arrs)
    shp = arrs[0].shape
    E = int(np.prod(shp))
    R0 = -(-E // 128)
    tr, n_r, Rp = _split(R0, 2048)
    Ep = Rp * 128
    stack = jnp.stack([jnp.pad(a.reshape(-1), (0, Ep - E)) for a in arrs],
                      axis=0).reshape(n, Rp, 128)
    out = pl.pallas_call(
        _max_stack_kernel,
        out_shape=jax.ShapeDtypeStruct((Rp, 128), arrs[0].dtype),
        grid=(n_r,),
        in_specs=[pl.BlockSpec((n, tr, 128), lambda i: (0, i, 0))],
        out_specs=pl.BlockSpec((tr, 128), lambda i: (i, 0)),
        compiler_params=pltpu.CompilerParams(
            dimension_semantics=("parallel",)),
    )(stack)
    return out.reshape(-1)[:E].reshape(shp)


@jax.jit
def maxpool3x3_s2p1(x):
    # TODO(synk): still builds the shifted-slice stack in XLA (small, runs once)
    B, H, W, C = x.shape
    Ho, Wo = (H - 1) // 2 + 1, (W - 1) // 2 + 1
    xp = jnp.pad(x, ((0, 0), (1, 1), (1, 1), (0, 0)), constant_values=-1e30)
    xw = _max_stack([xp[:, :, dx:dx + 2 * Wo:2, :] for dx in range(3)])
    return _max_stack([xw[:, dy:dy + 2 * Ho:2, :, :] for dy in range(3)])


# ----------------------------------------------------------------------------
# decoder glue: nearest-2x upsample + skip concat + channel pad + flatten,
# fused into one XLA op per decoder node
# ----------------------------------------------------------------------------
@functools.partial(jax.jit, static_argnames=("cp",))
def _upcat_jit(x, skips, *, cp):
    x = jnp.repeat(jnp.repeat(x, 2, axis=1), 2, axis=2)
    if skips:
        x = jnp.concatenate([x] + list(skips), axis=-1)
    B, H, W, C = x.shape
    d = jnp.pad(x.astype(jnp.bfloat16), ((0, 0), (0, 0), (0, 0), (0, cp - C)))
    Mo = H * W
    _, _, Mo_pad = _split(Mo, CAP)
    d = d.reshape(B, Mo, cp)
    if Mo_pad > Mo:
        d = jnp.pad(d, ((0, 0), (0, Mo_pad - Mo), (0, 0)))
    return d


# ----------------------------------------------------------------------------
# deterministic parameter construction (shapes as in smp.UnetPlusPlus/resnet50)
# weights are BN-folded, pre-padded to the kernel layout, and pre-cast to bf16.
# ----------------------------------------------------------------------------
class KeyGen:
    def __init__(self, seed):
        self._base = jax.random.PRNGKey(seed)
        self._i = 0

    def __call__(self):
        self._i += 1
        return jax.random.fold_in(self._base, self._i)


def make_conv(kg, k, cin, cout, *, direct, bn=True):
    fan_in = k * k * cin
    w = jax.random.normal(kg(), (k, k, cin, cout), jnp.float32) / np.sqrt(fan_in)
    if bn:
        gamma = jnp.ones((cout,), jnp.float32)
        beta = 0.01 * jax.random.normal(kg(), (cout,), jnp.float32)
        mean = jnp.zeros((cout,), jnp.float32)
        var = jnp.ones((cout,), jnp.float32)
        scale = gamma / jnp.sqrt(var + 1e-5)
        w = w * scale
        b = beta - mean * scale
    else:
        b = 0.01 * jax.random.normal(kg(), (cout,), jnp.float32)

    coutp = _round_up(cout, 128)
    if direct:
        cinp = _round_up(cin, 128)
        wl = jnp.pad(w.reshape(k * k, cin, cout),
                     ((0, 0), (0, cinp - cin), (0, coutp - cout)))
    else:
        kp = _round_up(fan_in, 128)
        wl = jnp.pad(w.reshape(1, fan_in, cout),
                     ((0, 0), (0, kp - fan_in), (0, coutp - cout)))
    return {"w": wl.astype(jnp.bfloat16),
            "b": jnp.pad(b.reshape(1, cout), ((0, 0), (0, coutp - cout))),
            "k": k, "cin": cin, "cout": cout, "direct": direct}


def make_bottleneck(kg, cin, mid, stride):
    p = {"stride": stride,
         "c1": make_conv(kg, 1, cin, mid, direct=True),
         "c2": make_conv(kg, 3, mid, mid, direct=(stride == 1)),
         "c3": make_conv(kg, 1, mid, mid * 4, direct=True)}
    if stride != 1 or cin != mid * 4:
        p["down"] = make_conv(kg, 1, cin, mid * 4, direct=(stride == 1))
    return p


def make_decoder_block(kg, cin_total, cout):
    return {"c1": make_conv(kg, 3, cin_total, cout, direct=True),
            "c2": make_conv(kg, 3, cout, cout, direct=True)}


def init_params(seed=42):
    kg = KeyGen(seed)
    P = {}
    # --- ResNet50 encoder ---
    P["conv1"] = make_conv(kg, 7, 3, 64, direct=False)          # 7x7 stride 2
    layer_cfg = [(3, 64, 1), (4, 128, 2), (6, 256, 2), (3, 512, 2)]
    cin = 64
    P["layers"] = []
    for nblocks, mid, stride in layer_cfg:
        blocks = []
        for bi in range(nblocks):
            s = stride if bi == 0 else 1
            blocks.append(make_bottleneck(kg, cin, mid, s))
            cin = mid * 4
        P["layers"].append(blocks)

    # --- UNet++ decoder (same channel wiring as smp.UnetPlusPlusDecoder) ---
    encoder_channels = (3, 64, 256, 512, 1024, 2048)
    decoder_channels = (256, 128, 64, 32, 16)
    ec = list(encoder_channels[1:])[::-1]            # [2048,1024,512,256,64]
    in_channels = [ec[0]] + list(decoder_channels[:-1])
    skip_channels = ec[1:] + [0]
    out_channels = list(decoder_channels)
    dec = {}
    for layer_idx in range(len(in_channels) - 1):
        for depth_idx in range(layer_idx + 1):
            if depth_idx == 0:
                in_ch = in_channels[layer_idx]
                skip_ch = skip_channels[layer_idx] * (layer_idx + 1)
                out_ch = out_channels[layer_idx]
            else:
                out_ch = skip_channels[layer_idx]
                skip_ch = skip_channels[layer_idx] * (layer_idx + 1 - depth_idx)
                in_ch = skip_channels[layer_idx - 1]
            dec[f"x_{depth_idx}_{layer_idx}"] = make_decoder_block(
                kg, in_ch + skip_ch, out_ch)
    dec[f"x_0_{len(in_channels) - 1}"] = make_decoder_block(
        kg, in_channels[-1], out_channels[-1])
    P["decoder"] = dec

    # --- segmentation head: Conv2d(16, 3, k=3, pad=1), with bias, no BN ---
    P["head"] = make_conv(kg, 3, 16, 3, direct=True, bn=False)
    return P


# ----------------------------------------------------------------------------
# forward pass
# ----------------------------------------------------------------------------
def bottleneck_fwd(x, p):
    s = p["stride"]
    out = conv(x, p["c1"], relu=True)
    out = conv(out, p["c2"], relu=True, stride=s)
    if "down" in p:
        idt = conv(x, p["down"], relu=False, stride=s)
    else:
        idt = x
    # residual add + ReLU fused into the c3 conv epilogue
    return conv(out, p["c3"], relu=True, res=idt)


def encoder_forward(x_nhwc, P):
    feats = []
    a1 = conv(x_nhwc, P["conv1"], relu=True, stride=2)   # conv1+bn+relu, 32x32x64
    feats.append(a1)                                     # features[1]
    h = act_from_nhwc(maxpool3x3_s2p1(act_to_nhwc(a1)))  # 16x16x64
    for blocks in P["layers"]:
        for bp in blocks:
            h = bottleneck_fwd(h, bp)
        feats.append(h)                                  # features[2..5]
    return feats                                         # [f1, f2, f3, f4, f5]


def decoder_block_fwd(x_nhwc, skips, p):
    cin = p["c1"]["cin"]
    assert x_nhwc.shape[-1] + sum(s.shape[-1] for s in skips) == cin
    cp = _round_up(cin, 128)
    B, H, W, _ = x_nhwc.shape
    d = _upcat_jit(x_nhwc, tuple(skips), cp=cp)
    a = Act(d, 2 * H, 2 * W, 2 * W, cin)
    a = conv(a, p["c1"], relu=True)
    a = conv(a, p["c2"], relu=True)
    return a


def decoder_forward(feats_acts, dparams):
    # feats_acts = [f5, f4, f3, f2, f1] as Acts; convert to NHWC once each
    feats = [act_to_nhwc(a) for a in feats_acts]
    depth = 4
    dense = {}
    for layer_idx in range(depth):
        for depth_idx in range(depth - layer_idx):
            if layer_idx == 0:
                a = decoder_block_fwd(feats[depth_idx], [feats[depth_idx + 1]],
                                      dparams[f"x_{depth_idx}_{depth_idx}"])
                dense[f"x_{depth_idx}_{depth_idx}"] = act_to_nhwc(a)
            else:
                li = depth_idx + layer_idx
                cat = [dense[f"x_{idx}_{li}"]
                       for idx in range(depth_idx + 1, li + 1)]
                cat = cat + [feats[li + 1]]
                a = decoder_block_fwd(dense[f"x_{depth_idx}_{li - 1}"], cat,
                                      dparams[f"x_{depth_idx}_{li}"])
                dense[f"x_{depth_idx}_{li}"] = act_to_nhwc(a)
    return decoder_block_fwd(dense[f"x_0_{depth - 1}"], [],
                             dparams[f"x_0_{depth}"])


def unet_forward(P, x_nchw):
    x = jnp.transpose(x_nchw, (0, 2, 3, 1))              # NCHW -> NHWC
    feats = encoder_forward(x, P)                        # [f1..f5] Acts
    d_act = decoder_forward(feats[::-1], P["decoder"])
    y_act = conv(d_act, P["head"], relu=False)           # segmentation head
    y = act_to_nhwc(y_act)                               # (B, 64, 64, 3)
    return jnp.transpose(y, (0, 3, 1, 2)).astype(jnp.float32)   # NHWC -> NCHW


# ----------------------------------------------------------------------------
if __name__ == "__main__":
    # ResNet50 encoder needs H, W divisible by 32 -> small 64x64 input.
    x = jax.random.normal(jax.random.PRNGKey(0), (2, 3, 64, 64), jnp.float32)
    params = init_params(seed=42)

    y = unet_forward(params, x)
    y = jax.block_until_ready(y)

    assert y.shape == (2, 3, 64, 64), y.shape
    assert y.dtype == jnp.float32
    assert bool(jnp.all(jnp.isfinite(y)))
    print("KERNEL_OK")
</pallas_src>

<mosaic_0001>
module attributes {stable_mosaic.version = 11 : i64} {
  func.func @_conv_kernel(%arg0: i32, %arg1: i32, %arg2: i32, %arg3: memref<1x1024x256xbf16, #tpu.memory_space<vmem>>, %arg4: memref<1x256x128xbf16, #tpu.memory_space<vmem>>, %arg5: memref<1x128xf32, #tpu.memory_space<vmem>>, %arg6: memref<1x512x128xbf16, #tpu.memory_space<vmem>>) attributes {dimension_semantics = [#tpu.dimension_semantics<parallel>, #tpu.dimension_semantics<parallel>, #tpu.dimension_semantics<parallel>], iteration_bounds = array<i64: 2, 1, 2>, scalar_prefetch = 0 : i64, scratch_operands = 0 : i64, tpu.core_type = #tpu.core_type<tc>, window_params = [{transform_indices = @transform_0, window_bounds = array<i64: 1, 1024, 256>}, {transform_indices = @transform_1, window_bounds = array<i64: 1, 256, 128>}, {transform_indices = @transform_2, window_bounds = array<i64: 1, 128>}, {transform_indices = @transform_3, window_bounds = array<i64: 1, 512, 128>}]} {
    %c512_i32 = arith.constant 512 : i32
    %0 = arith.muli %arg2, %c512_i32 : i32
    %1 = tpu.assume_multiple %0, 8 : i32
    %c0_i32 = arith.constant 0 : i32
    %2 = arith.addi %1, %c0_i32 : i32
    %c0 = arith.constant 0 : index
    %3 = arith.index_cast %2 : i32 to index
    %c0_0 = arith.constant 0 : index
    %4 = vector.load %arg3[%c0, %3, %c0_0] : memref<1x1024x256xbf16, #tpu.memory_space<vmem>>, vector<1x512x256xbf16>
    %5 = vector.shape_cast %4 : vector<1x512x256xbf16> to vector<512x256xbf16>
    %c0_1 = arith.constant 0 : index
    %c0_2 = arith.constant 0 : index
    %c0_3 = arith.constant 0 : index
    %6 = vector.load %arg4[%c0_1, %c0_2, %c0_3] : memref<1x256x128xbf16, #tpu.memory_space<vmem>>, vector<1x256x128xbf16>
    %7 = vector.shape_cast %6 : vector<1x256x128xbf16> to vector<256x128xbf16>
    %cst = arith.constant dense<0.000000e+00> : vector<512x128xf32>
    %8 = tpu.matmul %5, %7, %cst {dimension_numbers = #tpu.dot_dimension_numbers<[1], [0], [0], [1], [0, 0, 1, 1], [], []>} : vector<512x256xbf16>, vector<256x128xbf16>, vector<512x128xf32> -> vector<512x128xf32>
    %c0_4 = arith.constant 0 : index
    %c0_5 = arith.constant 0 : index
    %9 = vector.load %arg5[%c0_4, %c0_5] : memref<1x128xf32, #tpu.memory_space<vmem>>, vector<1x128xf32>
    %10 = vector.broadcast %9 : vector<1x128xf32> to vector<512x128xf32>
    %11 = arith.addf %8, %10 : vector<512x128xf32>
    %cst_6 = arith.constant 0.000000e+00 : f32
    %12 = vector.broadcast %cst_6 : f32 to vector<512x128xf32>
    %13 = arith.maximumf %11, %12 : vector<512x128xf32>
    %14 = arith.truncf %13 : vector<512x128xf32> to vector<512x128xbf16>
    %c0_7 = arith.constant 0 : index
    %c0_8 = arith.constant 0 : index
    %c0_9 = arith.constant 0 : index
    %15 = vector.load %arg6[%c0_7, %c0_8, %c0_9] : memref<1x512x128xbf16, #tpu.memory_space<vmem>>, vector<1x512x128xbf16>
    %16 = vector.shape_cast %15 : vector<1x512x128xbf16> to vector<512x128xbf16>
    %17 = vector.shape_cast %14 : vector<512x128xbf16> to vector<1x512x128xbf16>
    tpu.vector_store %arg6[%c0_7, %c0_8, %c0_9], %17 {strides = array<i32>} : memref<1x512x128xbf16, #tpu.memory_space<vmem>>, vector<1x512x128xbf16>,
    return
  }
  func.func @transform_0(%arg0: i32, %arg1: i32, %arg2: i32) -> (i32, i32, i32) {
    %c0_i32 = arith.constant 0 : i32
    %c0_i32_0 = arith.constant 0 : i32
    %c0_i32_1 = arith.constant 0 : i32
    return %arg0, %c0_i32, %c0_i32_0 : i32, i32, i32
  }
  func.func @transform_1(%arg0: i32, %arg1: i32, %arg2: i32) -> (i32, i32, i32) {
    %c0_i32 = arith.constant 0 : i32
    %c0_i32_0 = arith.constant 0 : i32
    %c0_i32_1 = arith.constant 0 : i32
    return %c0_i32, %c0_i32_0, %arg1 : i32, i32, i32
  }
  func.func @transform_2(%arg0: i32, %arg1: i32, %arg2: i32) -> (i32, i32) {
    %c0_i32 = arith.constant 0 : i32
    %c0_i32_0 = arith.constant 0 : i32
    return %c0_i32, %arg1 : i32, i32
  }
  func.func @transform_3(%arg0: i32, %arg1: i32, %arg2: i32) -> (i32, i32, i32) {
    %c0_i32 = arith.constant 0 : i32
    return %arg0, %arg2, %arg1 : i32, i32, i32
  }
}

</mosaic_0001>

<bundles_post_ra>
// kernel: _conv_im2col_jit.1
= control target key start
LH: loop header
LB: loop body
LE: loop exit
PB: predicated region body
PF: predicated region fallthrough
CT: control target
= control target key end

     0   :  { %8 = vsyncpa [#allocation3], 0  ;;  %s2701_s0 = inlined_call_operand.vmem [shape: bf16[2,1024,256], index: 0, kind: input, shape index: {}]   ;;  %s2702_s1 = inlined_call_operand.vmem [shape: bf16[1,256,128], index: 1, kind: input, shape index: {}]   ;;  %s2703_s2 = inlined_call_operand.vmem [shape: f32[1,128], index: 2, kind: input, shape index: {}]   ;;  %s2704_s3 = inlined_call_operand.hbm [shape: bf16[2,1024,128], index: 3, kind: output, shape index: {}]  }
   0x1   :  { %10 = vsyncpa [#allocation3 + $0x1], 0  ;;  %s2308_s12 = smov 0   ;;  %s2310_s13 = smov 0  }
   0x2   :  { %s2312_s14 = smov 0   ;;  %s2314_s15 = smov 0  }
   0x3   :  { %s2316_s16 = smov 0   ;;  %s2318_s17 = smov 0  }
   0x4   :  { %s2320_s18 = smov 0   ;;  %s2322_s19 = smov 0  }
   0x5 LB: > { %s1549_s20 = sadd.s32 4294967295, %s2282_s19   ;;  %s1550_s21 = sadd.s32 4294967294, %s2282_s19   ;;  %s2282_s19 = sphi %s2322_s19, %s16_s19   ;;  %s2278_s18 = sphi %s2320_s18, %s2713_s18   ;;  %s2274_s17 = sphi %s2318_s17, %s2712_s17   ;;  %s2270_s16 = sphi %s2316_s16, %s2711_s16   ;;  %s2266_s15 = sphi %s2314_s15, %s2710_s15   ;;  %s2262_s14 = sphi %s2312_s14, %s2709_s14   ;;  %s2258_s13 = sphi %s2310_s13, %s2708_s13   ;;  %s2254_s12 = sphi %s2308_s12, %s2707_s12  }
   0x6   : > { %s28_s22 = sadd.s32 1, %s2274_s17  ;;  %s35_s23 = sadd.s32 1, %s2278_s18 }
   0x7   : > { %p29_p0 = scmp.ge.s32.totalorder %s28_s22, 2  ;;  %p134_p1 = scmp.ne.s32.totalorder %s2262_s14, %s2258_s13 }
   0x8   : > { %p135_p2 = scmp.eq.s32.totalorder %s1549_s20, 3  ;;  %p140_p5 = scmp.ne.s32.totalorder %s2258_s13, %s2254_s12 }
   0x9   : > { %s2715_s22 = smov (%p29_p0, %s28_s22), 0  ;;  %s2717_s23 = smov (!%p29_p0, %s35_s23), %s2278_s18 }
   0xa   : > { %s118_s24 = ssub.s32 %s2274_s17, %s2715_s22  ;;  %p2359_p3 = por %p135_p2, %p134_p1 }
   0xb   : > { %p37_p4 = scmp.ge.s32.totalorder %s2717_s23, 2  ;;  %p141_p6 = scmp.eq.s32.totalorder %s1550_s21, 3 }
   0xc   : > { %p1555_p7 = scmp.ge.s32.totalorder %s2282_s19, 1  ;;  %p180_p9 = scmp.lt.s32.totalorder %s2282_s19, 5 }
   0xd   : > { %s2719_s23 = smov (%p37_p4, %s2717_s23), 0  ;;  %p2368_p8 = por %p141_p6, %p140_p5 }
   0xe   : > { %s117_s27 = ssub.s32 %s2278_s18, %s2719_s23  ;;  %s124_s28 = sadd.s32 1, %s2262_s14 }
   0xf   : > { %s119_s29 = sor.u32 %s118_s24, %s117_s27  ;;  %p181_p10 = pnand %p1555_p7, %p180_p9 }
  0x10   : > { %p122_p11 = scmp.eq.s32.totalorder %s119_s29, 0  ;;  %v2076_v0 = vld [vmem:[%s2702_s1] sm:$0xff] (!%p181_p10)   ;;  %v2284_v1 = vmov (!%p181_p10), 0   ;;  %p211_p12 = scmp.lt.s32.totalorder (!%p181_p10), %s2270_s16, 1  ;;  %v2077_v2 = vld [vmem:[%s2702_s1 + $0x8] sm:$0xff] (!%p181_p10)   ;;  %v2078_v3 = vld [vmem:[%s2702_s1 + $0x10] sm:$0xff] (!%p181_p10)  }
  0x11   : > { %184 = sbr.rel (%p181_p10) target bundleno = 437 (0x1b5), region = 32  ;;  %750 = vmatprep.subr.bf16.mxu0 (!%p181_p10), %v2284_v1  ;;  %1970 = vmatprep.subr.bf16.mxu1 (!%p181_p10), %v2284_v1  ;;  %v2079_v4 = vld [vmem:[%s2702_s1 + $0x18] sm:$0xff] (!%p181_p10)   ;;  %s1559_s29 = sshll.u32 (!%p181_p10), %s2266_s15, 9  ;;  %v2080_v5 = vld [vmem:[%s2702_s1 + $0x20] sm:$0xff] (!%p181_p10)   ;;  %v2081_v7 = vld [vmem:[%s2702_s1 + $0x28] sm:$0xff] (!%p181_p10)  }
  0x12   : > { %s2377_s30 = scalar_select %p122_p11, %s2262_s14, %s124_s28  }
  0x13   : > { %751 = vmatpush1.bf16.msra.mxu0 (!%p181_p10), %v2076_v0  ;;  %1986 = vmatpush1.bf16.msra.mxu1 (!%p181_p10), %v2076_v0  ;;  %v2082_v9 = vld [vmem:[%s2702_s1 + $0x30] sm:$0xff] (!%p181_p10)   ;;  %v2083_v10 = vld [vmem:[%s2702_s1 + $0x38] sm:$0xff] (!%p181_p10)   ;;  %v2084_v11 = vld [vmem:[%s2702_s1 + $0x40] sm:$0xff] (!%p181_p10)   ;;  %s208_s4 = sand.u32 (!%p181_p10), 1, %s2258_s13   ;;  %s1708_s7 = sshll.u32 (!%p181_p10), %s2266_s15, 6 }
  0x14   : > { %752 = vmatprep.subr.bf16.mxu0 (!%p181_p10), %v2284_v1  ;;  %1971 = vmatprep.subr.bf16.mxu1 (!%p181_p10), %v2284_v1  ;;  %v2085_v12 = vld [vmem:[%s2702_s1 + $0x48] sm:$0xff] (!%p181_p10)   ;;  %v2086_v13 = vld [vmem:[%s2702_s1 + $0x50] sm:$0xff] (!%p181_p10)   ;;  %v2087_v14 = vld [vmem:[%s2702_s1 + $0x58] sm:$0xff] (!%p181_p10)   ;;  %s2649_s21 = scalar_lea.sflag (!%p181_p10), [#allocation3], %s208_s4  ;;  %s2285_s27 = smov (!%p181_p10), [#allocation2]  }
  0x15   : > { %v2088_v15 = vld [vmem:[%s2702_s1 + $0x60] sm:$0xff] (!%p181_p10)   ;;  %v2089_v16 = vld [vmem:[%s2702_s1 + $0x68] sm:$0xff] (!%p181_p10)   ;;  %v2090_v17 = vld [vmem:[%s2702_s1 + $0x70] sm:$0xff] (!%p181_p10)  }
  0x16   : > { %v2091_v18 = vld [vmem:[%s2702_s1 + $0x78] sm:$0xff] (!%p181_p10)  }
  0x17   : > { %753 = vmatpush1.bf16.msra.mxu0 (!%p181_p10), %v2077_v2  ;;  %1987 = vmatpush1.bf16.msra.mxu1 (!%p181_p10), %v2077_v2 }
  0x18   : > { %s212_s8 = scalar_select %p211_p12, %s2270_s16, 1  ;;  %754 = vmatprep.subr.bf16.mxu0 %v2284_v1  ;;  %1972 = vmatprep.subr.bf16.mxu1 %v2284_v1 }
  0x1a   : > { %s1713_s11 = sshll.u32 %s212_s8, 10  ;;  %s1709_s8 = sshll.u32 %s2270_s16, 7 }
  0x1b   : > { %755 = vmatpush1.bf16.msra.mxu0 %v2078_v3  ;;  %1988 = vmatpush1.bf16.msra.mxu1 %v2078_v3  ;;  %s215_s28 = scalar_lea.vmem %s2701_s0, %s1713_s11  ;;  %s1437_s9 = sadd.s32 %s1709_s8, %s1708_s7 }
  0x1c   : > { %756 = vmatprep.subr.bf16.mxu0 %v2284_v1  ;;  %1973 = vmatprep.subr.bf16.mxu1 %v2284_v1  ;;  %s2408_s6 = scalar_lea.vmem %s215_s28, %s1559_s29  ;;  %s1710_s15 = sshll.u32 %s1437_s9, 6 }
  0x1d   : > { %v2094_v6 = vld [vmem:[%s2408_s6 + $0x4] ss:$8 sps:$4 sm:$0xff]   ;;  %v2092_v19 = vld [vmem:[%s2408_s6] ss:$8 sps:$4 sm:$0xff]   ;;  %v2098_v21 = vld [vmem:[%s2408_s6 + $0x14] ss:$8 sps:$4 sm:$0xff]   ;;  %s2641_s20 = scalar_lea.hbm %s2704_s3, %s1710_s15 }
  0x1e   : > { %v2097_v8 = vld [vmem:[%s2408_s6 + $0x104] ss:$8 sps:$4 sm:$0xff]   ;;  %782 = vmatprep.mubr.bf16.mxu0 %v2094_v6  ;;  %v2095_v20 = vld [vmem:[%s2408_s6 + $0x100] ss:$8 sps:$4 sm:$0xff]   ;;  %v2100_v22 = vld [vmem:[%s2408_s6 + $0x114] ss:$8 sps:$4 sm:$0xff]  }
  0x1f   : > { %757 = vmatpush1.bf16.msra.mxu0 %v2079_v4  ;;  %1989 = vmatpush1.bf16.msra.mxu1 %v2079_v4  ;;  %v2102_v23 = vld [vmem:[%s2408_s6 + $0x10] ss:$8 sps:$4 sm:$0xff]   ;;  %v2104_v25 = vld [vmem:[%s2408_s6 + $0x24] ss:$8 sps:$4 sm:$0xff]   ;;  %v2108_v27 = vld [vmem:[%s2408_s6 + $0x20] ss:$8 sps:$4 sm:$0xff]  }
  0x20   : > { %758 = vmatprep.subr.bf16.mxu0 %v2284_v1  ;;  %1974 = vmatprep.subr.bf16.mxu1 %v2284_v1  ;;  %v2103_v24 = vld [vmem:[%s2408_s6 + $0x110] ss:$8 sps:$4 sm:$0xff]   ;;  %v2106_v26 = vld [vmem:[%s2408_s6 + $0x124] ss:$8 sps:$4 sm:$0xff]   ;;  %v2109_v28 = vld [vmem:[%s2408_s6 + $0x120] ss:$8 sps:$4 sm:$0xff]  }
  0x21   : > { %910 = vmatprep.mubr.bf16.mxu1 %v2097_v8  ;;  %v2110_v29 = vld [vmem:[%s2408_s6 + $0x34] ss:$8 sps:$4 sm:$0xff]   ;;  %v2114_v31 = vld [vmem:[%s2408_s6 + $0x30] ss:$8 sps:$4 sm:$0xff]   ;;  %v2116_v33 = vld [vmem:[%s2408_s6 + $0x44] ss:$8 sps:$4 sm:$0xff]  }
  0x22   : > { %v2112_v30 = vld [vmem:[%s2408_s6 + $0x134] ss:$8 sps:$4 sm:$0xff]   ;;  %v2115_v32 = vld [vmem:[%s2408_s6 + $0x130] ss:$8 sps:$4 sm:$0xff]   ;;  %v2118_v34 = vld [vmem:[%s2408_s6 + $0x144] ss:$8 sps:$4 sm:$0xff]  }
  0x23   : > { %759 = vmatpush1.bf16.msra.mxu0 %v2080_v5  ;;  %1990 = vmatpush1.bf16.msra.mxu1 %v2080_v5  ;;  %v2120_v35 = vld [vmem:[%s2408_s6 + $0x40] ss:$8 sps:$4 sm:$0xff]   ;;  %v2122_v37 = vld [vmem:[%s2408_s6 + $0x54] ss:$8 sps:$4 sm:$0xff]   ;;  %v2126_v39 = vld [vmem:[%s2408_s6 + $0x50] ss:$8 sps:$4 sm:$0xff]  }
  0x24   : > { %760 = vmatprep.subr.bf16.mxu0 %v2284_v1  ;;  %1975 = vmatprep.subr.bf16.mxu1 %v2284_v1  ;;  %v2121_v36 = vld [vmem:[%s2408_s6 + $0x140] ss:$8 sps:$4 sm:$0xff]   ;;  %v2124_v38 = vld [vmem:[%s2408_s6 + $0x154] ss:$8 sps:$4 sm:$0xff]   ;;  %v2127_v40 = vld [vmem:[%s2408_s6 + $0x150] ss:$8 sps:$4 sm:$0xff]  }
  0x25   : > { %v2128_v41 = vld [vmem:[%s2408_s6 + $0x64] ss:$8 sps:$4 sm:$0xff]   ;;  %v2132_v43 = vld [vmem:[%s2408_s6 + $0x60] ss:$8 sps:$4 sm:$0xff]   ;;  %v2134_v45 = vld [vmem:[%s2408_s6 + $0x74] ss:$8 sps:$4 sm:$0xff]  }
  0x26   : > { %v2130_v42 = vld [vmem:[%s2408_s6 + $0x164] ss:$8 sps:$4 sm:$0xff]   ;;  %v2133_v44 = vld [vmem:[%s2408_s6 + $0x160] ss:$8 sps:$4 sm:$0xff]   ;;  %v2136_v46 = vld [vmem:[%s2408_s6 + $0x174] ss:$8 sps:$4 sm:$0xff]  }
  0x27   : > { %761 = vmatpush1.bf16.msra.mxu0 %v2081_v7  ;;  %1991 = vmatpush1.bf16.msra.mxu1 %v2081_v7  ;;  %v2138_v47 = vld [vmem:[%s2408_s6 + $0x70] ss:$8 sps:$4 sm:$0xff]   ;;  %v2140_v49 = vld [vmem:[%s2408_s6 + $0x84] ss:$8 sps:$4 sm:$0xff]   ;;  %v2144_v51 = vld [vmem:[%s2408_s6 + $0x80] ss:$8 sps:$4 sm:$0xff]  }
  0x28   : > { %762 = vmatprep.subr.bf16.mxu0 %v2284_v1  ;;  %1976 = vmatprep.subr.bf16.mxu1 %v2284_v1  ;;  %v2139_v48 = vld [vmem:[%s2408_s6 + $0x170] ss:$8 sps:$4 sm:$0xff]   ;;  %v2142_v50 = vld [vmem:[%s2408_s6 + $0x184] ss:$8 sps:$4 sm:$0xff]   ;;  %v2145_v52 = vld [vmem:[%s2408_s6 + $0x180] ss:$8 sps:$4 sm:$0xff]  }
  0x29   : > { %v2146_v53 = vld [vmem:[%s2408_s6 + $0x94] ss:$8 sps:$4 sm:$0xff]   ;;  %v2150_v55 = vld [vmem:[%s2408_s6 + $0x90] ss:$8 sps:$4 sm:$0xff]   ;;  %v2152_v57 = vld [vmem:[%s2408_s6 + $0xa4] ss:$8 sps:$4 sm:$0xff]  }
  0x2a   : > { %v2148_v54 = vld [vmem:[%s2408_s6 + $0x194] ss:$8 sps:$4 sm:$0xff]   ;;  %v2151_v56 = vld [vmem:[%s2408_s6 + $0x190] ss:$8 sps:$4 sm:$0xff]   ;;  %v2154_v58 = vld [vmem:[%s2408_s6 + $0x1a4] ss:$8 sps:$4 sm:$0xff]  }
  0x2b   : > { %763 = vmatpush1.bf16.msra.mxu0 %v2082_v9  ;;  %1992 = vmatpush1.bf16.msra.mxu1 %v2082_v9  ;;  %v2156_v59 = vld [vmem:[%s2408_s6 + $0xa0] ss:$8 sps:$4 sm:$0xff]   ;;  %v2158_v61 = vld [vmem:[%s2408_s6 + $0xb4] ss:$8 sps:$4 sm:$0xff]   ;;  %v2162_v63 = vld [vmem:[%s2408_s6 + $0xb0] ss:$8 sps:$4 sm:$0xff]  }
  0x2c   : > { %764 = vmatprep.subr.bf16.mxu0 %v2284_v1  ;;  %1977 = vmatprep.subr.bf16.mxu1 %v2284_v1  ;;  %v2157_v60 = vld [vmem:[%s2408_s6 + $0x1a0] ss:$8 sps:$4 sm:$0xff]   ;;  %v2160_v62 = vld [vmem:[%s2408_s6 + $0x1b4] ss:$8 sps:$4 sm:$0xff]   ;;  %v2163_v0 = vld [vmem:[%s2408_s6 + $0x1b0] ss:$8 sps:$4 sm:$0xff]  }
  0x2d   : > { %v2166_v2 = vld [vmem:[%s2408_s6 + $0x1c4] ss:$8 sps:$4 sm:$0xff]   ;;  %v2168_v3 = vld [vmem:[%s2408_s6 + $0xc0] ss:$8 sps:$4 sm:$0xff]   ;;  %v2170_v5 = vld [vmem:[%s2408_s6 + $0xd4] ss:$8 sps:$4 sm:$0xff]  }
  0x2e   : > { %v2169_v4 = vld [vmem:[%s2408_s6 + $0x1c0] ss:$8 sps:$4 sm:$0xff]   ;;  %v2172_v6 = vld [vmem:[%s2408_s6 + $0x1d4] ss:$8 sps:$4 sm:$0xff]   ;;  %v2174_v7 = vld [vmem:[%s2408_s6 + $0xd0] ss:$8 sps:$4 sm:$0xff]  }
  0x2f   : > { %765 = vmatpush1.bf16.msra.mxu0 %v2083_v10  ;;  %1993 = vmatpush1.bf16.msra.mxu1 %v2083_v10  ;;  %v2175_v8 = vld [vmem:[%s2408_s6 + $0x1d0] ss:$8 sps:$4 sm:$0xff]   ;;  %v2176_v9 = vld [vmem:[%s2408_s6 + $0xe4] ss:$8 sps:$4 sm:$0xff]   ;;  %s2192_s28 = sshll.u32 %s2285_s27, 4  ;;  %s2193_s28 = int_to_ptr.vmem [resolvable:$false] %s2192_s28 }
  0x30   : > { %766 = vmatprep.subr.bf16.mxu0 %v2284_v1  ;;  %1978 = vmatprep.subr.bf16.mxu1 %v2284_v1  ;;  %v2178_v10 = vld [vmem:[%s2408_s6 + $0x1e4] ss:$8 sps:$4 sm:$0xff]   ;;  %s2194_s29 = scalar_lea.vmem %s2193_s28, 8192 }
  0x33   : > { %767 = vmatpush1.bf16.msra.mxu0 %v2084_v11  ;;  %1994 = vmatpush1.bf16.msra.mxu1 %v2084_v11  ;;  %v2180_v11 = vld [vmem:[%s2408_s6 + $0xe0] ss:$8 sps:$4 sm:$0xff]  }
  0x34   : > { %768 = vmatprep.subr.bf16.mxu0 %v2284_v1  ;;  %1979 = vmatprep.subr.bf16.mxu1 %v2284_v1 }
  0x37   : > { %769 = vmatpush1.bf16.msra.mxu0 %v2085_v12  ;;  %1995 = vmatpush1.bf16.msra.mxu1 %v2085_v12  ;;  %v2181_v12 = vld [vmem:[%s2408_s6 + $0x1e0] ss:$8 sps:$4 sm:$0xff]  }
  0x38   : > { %770 = vmatprep.subr.bf16.mxu0 %v2284_v1  ;;  %1980 = vmatprep.subr.bf16.mxu1 %v2284_v1 }
  0x3b   : > { %771 = vmatpush1.bf16.msra.mxu0 %v2086_v13  ;;  %1996 = vmatpush1.bf16.msra.mxu1 %v2086_v13  ;;  %v2182_v13 = vld [vmem:[%s2408_s6 + $0xf4] ss:$8 sps:$4 sm:$0xff]  }
  0x3c   : > { %772 = vmatprep.subr.bf16.mxu0 %v2284_v1  ;;  %1981 = vmatprep.subr.bf16.mxu1 %v2284_v1 }
  0x3f   : > { %773 = vmatpush1.bf16.msra.mxu0 %v2087_v14  ;;  %1997 = vmatpush1.bf16.msra.mxu1 %v2087_v14  ;;  %v2184_v14 = vld [vmem:[%s2408_s6 + $0x1f4] ss:$8 sps:$4 sm:$0xff]  }
  0x40   : > { %774 = vmatprep.subr.bf16.mxu0 %v2284_v1  ;;  %1982 = vmatprep.subr.bf16.mxu1 %v2284_v1 }
  0x43   : > { %775 = vmatpush1.bf16.msra.mxu0 %v2088_v15  ;;  %1998 = vmatpush1.bf16.msra.mxu1 %v2088_v15  ;;  %v2186_v15 = vld [vmem:[%s2408_s6 + $0xf0] ss:$8 sps:$4 sm:$0xff]  }
  0x44   : > { %776 = vmatprep.subr.bf16.mxu0 %v2284_v1  ;;  %1983 = vmatprep.subr.bf16.mxu1 %v2284_v1 }
  0x47   : > { %777 = vmatpush1.bf16.msra.mxu0 %v2089_v16  ;;  %1999 = vmatpush1.bf16.msra.mxu1 %v2089_v16  ;;  %v2187_v16 = vld [vmem:[%s2408_s6 + $0x1f0] ss:$8 sps:$4 sm:$0xff]  }
  0x48   : > { %778 = vmatprep.subr.bf16.mxu0 %v2284_v1  ;;  %1984 = vmatprep.subr.bf16.mxu1 %v2284_v1 }
  0x4b   : > { %779 = vmatpush1.bf16.msra.mxu0 %v2090_v17  ;;  %2000 = vmatpush1.bf16.msra.mxu1 %v2090_v17  ;;  %v2534_v17 = vld [vmem:[%s2703_s2] ss:$0 sm:$0xff] }
  0x4c   : > { %780 = vmatprep.subr.bf16.mxu0 %v2284_v1  ;;  %1985 = vmatprep.subr.bf16.mxu1 %v2284_v1  ;;  %v2164_v1 = vld [vmem:[%s2408_s6 + $0xc4] ss:$8 sps:$4 sm:$0xff]   ;;  %s1556_s6 = sshll.u32 %s208_s4, 8 }
  0x4d   : > { %s2543_s5 = scalar_lea.vmem [#allocation2], %s1556_s6 }
  0x4e   : > { %s1440_s16 = sshll.u32 %s2543_s5, 4  ;;  %s2643_s16 = int_to_ptr.vmem [resolvable:$true] %s1440_s16 }
  0x4f   : > { %781 = vmatpush1.bf16.msra.mxu0 %v2091_v18  ;;  %2001 = vmatpush1.bf16.msra.mxu1 %v2091_v18  ;;  %s2188_s24 = scalar_lea.vmem %s2643_s16, 4096  ;;  %p2195_p2 = scmp.lt.s32.totalorder %s2643_s16, %s2193_s28 }
  0x50   : > { %p2189_p13 = scmp.ne.s32.totalorder %s2643_s16, %s2188_s24  ;;  %p2196_p4 = scmp.lt.s32.totalorder %s2194_s29, %s2188_s24 }
  0x52   : > { %783 = vmatmul.mubr.bf16.vlgmr.msra.gmra.mrb[0].mxu0 %v2092_v19  ;;  %911 = vmatmul.mubr.bf16.vlgmr.msra.gmra.mrb[0].mxu1 %v2095_v20  ;;  %p2190_p0 = pnand %p2189_p13, %p2359_p3  ;;  %p2197_p5 = por %p2196_p4, %p2195_p2 }
  0x53   : > { %790 = vmatprep.mubr.bf16.mxu0 %v2098_v21  ;;  %918 = vmatprep.mubr.bf16.mxu1 %v2100_v22 }
  0x54   : > { %p2191_p1 = pneg %p2190_p0 }
  0x56   : > { %p2198_p6 = pnand %p2197_p5, %p2191_p1 }
  0x5a   : > { %791 = vmatmul.mubr.bf16.gmra.mrb[4].mxu0 %v2102_v23  ;;  %919 = vmatmul.mubr.bf16.gmra.mrb[4].mxu1 %v2103_v24 }
  0x5b   : > { %798 = vmatprep.mubr.bf16.mxu0 %v2104_v25  ;;  %926 = vmatprep.mubr.bf16.mxu1 %v2106_v26 }
  0x62   : > { %799 = vmatmul.mubr.bf16.gmra.mrb[8].mxu0 %v2108_v27  ;;  %927 = vmatmul.mubr.bf16.gmra.mrb[8].mxu1 %v2109_v28 }
  0x63   : > { %806 = vmatprep.mubr.bf16.mxu0 %v2110_v29  ;;  %934 = vmatprep.mubr.bf16.mxu1 %v2112_v30 }
  0x6a   : > { %807 = vmatmul.mubr.bf16.gmra.mrb[12].mxu0 %v2114_v31  ;;  %935 = vmatmul.mubr.bf16.gmra.mrb[12].mxu1 %v2115_v32 }
  0x6b   : > { %814 = vmatprep.mubr.bf16.mxu0 %v2116_v33  ;;  %942 = vmatprep.mubr.bf16.mxu1 %v2118_v34 }
  0x72   : > { %815 = vmatmul.mubr.bf16.gmra.mrb[16].mxu0 %v2120_v35  ;;  %943 = vmatmul.mubr.bf16.gmra.mrb[16].mxu1 %v2121_v36 }
  0x73   : > { %822 = vmatprep.mubr.bf16.mxu0 %v2122_v37  ;;  %950 = vmatprep.mubr.bf16.mxu1 %v2124_v38 }
  0x7a   : > { %823 = vmatmul.mubr.bf16.gmra.mrb[20].mxu0 %v2126_v39  ;;  %951 = vmatmul.mubr.bf16.gmra.mrb[20].mxu1 %v2127_v40 }
  0x7b   : > { %830 = vmatprep.mubr.bf16.mxu0 %v2128_v41  ;;  %958 = vmatprep.mubr.bf16.mxu1 %v2130_v42 }
  0x82   : > { %831 = vmatmul.mubr.bf16.gmra.mrb[24].mxu0 %v2132_v43  ;;  %959 = vmatmul.mubr.bf16.gmra.mrb[24].mxu1 %v2133_v44 }
  0x83   : > { %838 = vmatprep.mubr.bf16.mxu0 %v2134_v45  ;;  %966 = vmatprep.mubr.bf16.mxu1 %v2136_v46 }
  0x8a   : > { %839 = vmatmul.mubr.bf16.gmra.mrb[28].mxu0 %v2138_v47  ;;  %967 = vmatmul.mubr.bf16.gmra.mrb[28].mxu1 %v2139_v48 }
  0x8b   : > { %846 = vmatprep.mubr.bf16.mxu0 %v2140_v49  ;;  %974 = vmatprep.mubr.bf16.mxu1 %v2142_v50 }
  0x92   : > { %847 = vmatmul.mubr.bf16.gmra.mrb[32].mxu0 %v2144_v51  ;;  %975 = vmatmul.mubr.bf16.gmra.mrb[32].mxu1 %v2145_v52 }
  0x93   : > { %854 = vmatprep.mubr.bf16.mxu0 %v2146_v53  ;;  %982 = vmatprep.mubr.bf16.mxu1 %v2148_v54 }
  0x9a   : > { %855 = vmatmul.mubr.bf16.gmra.mrb[36].mxu0 %v2150_v55  ;;  %983 = vmatmul.mubr.bf16.gmra.mrb[36].mxu1 %v2151_v56 }
  0x9b   : > { %862 = vmatprep.mubr.bf16.mxu0 %v2152_v57  ;;  %990 = vmatprep.mubr.bf16.mxu1 %v2154_v58 }
  0xa2   : > { %863 = vmatmul.mubr.bf16.gmra.mrb[40].mxu0 %v2156_v59  ;;  %991 = vmatmul.mubr.bf16.gmra.mrb[40].mxu1 %v2157_v60 }
  0xa3   : > { %870 = vmatprep.mubr.bf16.mxu0 %v2158_v61  ;;  %998 = vmatprep.mubr.bf16.mxu1 %v2160_v62 }
  0xaa   : > { %871 = vmatmul.mubr.bf16.gmra.mrb[44].mxu0 %v2162_v63  ;;  %999 = vmatmul.mubr.bf16.gmra.mrb[44].mxu1 %v2163_v0 }
  0xab   : > { %878 = vmatprep.mubr.bf16.mxu0 %v2164_v1  ;;  %1006 = vmatprep.mubr.bf16.mxu1 %v2166_v2 }
  0xb2   : > { %879 = vmatmul.mubr.bf16.gmra.mrb[48].mxu0 %v2168_v3  ;;  %1007 = vmatmul.mubr.bf16.gmra.mrb[48].mxu1 %v2169_v4 }
  0xb3   : > { %886 = vmatprep.mubr.bf16.mxu0 %v2170_v5  ;;  %1014 = vmatprep.mubr.bf16.mxu1 %v2172_v6 }
  0xba   : > { %887 = vmatmul.mubr.bf16.gmra.mrb[52].mxu0 %v2174_v7  ;;  %1015 = vmatmul.mubr.bf16.gmra.mrb[52].mxu1 %v2175_v8 }
  0xbb   : > { %894 = vmatprep.mubr.bf16.mxu0 %v2176_v9  ;;  %1022 = vmatprep.mubr.bf16.mxu1 %v2178_v10 }
  0xc2   : > { %895 = vmatmul.mubr.bf16.gmra.mrb[56].mxu0 %v2180_v11  ;;  %1023 = vmatmul.mubr.bf16.gmra.mrb[56].mxu1 %v2181_v12 }
  0xc3   : > { %902 = vmatprep.mubr.bf16.mxu0 %v2182_v13  ;;  %1030 = vmatprep.mubr.bf16.mxu1 %v2184_v14 }
  0xca   : > { %903 = vmatmul.mubr.bf16.gmra.mrb[60].mxu0 %v2186_v15  ;;  %1031 = vmatmul.mubr.bf16.gmra.mrb[60].mxu1 %v2187_v16 }
 0x125   : > { %v784_v18 = vpop.f32.mrb[0].mxu0  ;;  %v912_v19 = vpop.f32.mrb[0].mxu1 }
 0x126   : > { %v785_v20 = vadd.f32 %v2534_v17, %v784_v18  ;;  %v913_v21 = vadd.f32 %v2534_v17, %v912_v19  ;;  %v786_v22 = vpop.f32.mrb[1].mxu0  ;;  %v914_v23 = vpop.f32.mrb[1].mxu1 }
 0x127   : > { %v787_v24 = vpop.f32.mrb[2].mxu0  ;;  %v915_v25 = vpop.f32.mrb[2].mxu1 }
 0x128   : > { %v788_v26 = vadd.f32 %v2534_v17, %v787_v24  ;;  %v916_v27 = vadd.f32 %v2534_v17, %v915_v25  ;;  %v789_v28 = vpop.f32.mrb[3].mxu0  ;;  %v917_v29 = vpop.f32.mrb[3].mxu1  ;;  %v1039_v30 = vmax.f32 %v785_v20, 0.0  ;;  %v1071_v31 = vmax.f32 %v913_v21, 0.0 }
 0x12a   : > { %v1040_v32 = vmax.f32 %v788_v26, 0.0  ;;  %v1072_v33 = vmax.f32 %v916_v27, 0.0 }
 0x12c   : > { %v1782_v34 = vpack.c.bf16 %v1040_v32, %v1039_v30  ;;  %v1862_v35 = vpack.c.bf16 %v1072_v33, %v1071_v31 }
 0x12d   : > { %v792_v36 = vpop.f32.mrb[4].mxu0  ;;  %v920_v37 = vpop.f32.mrb[4].mxu1 }
 0x12e   : > { %1783 = vst [vmem:[%s2543_s5] sm:$0xff] %v1782_v34   ;;  %1954 = vst [vmem:[%s2543_s5 + $0x80] sm:$0xff] %v1862_v35   ;;  %v793_v38 = vadd.f32 %v2534_v17, %v792_v36  ;;  %v921_v39 = vadd.f32 %v2534_v17, %v920_v37  ;;  %v794_v40 = vpop.f32.mrb[5].mxu0  ;;  %v922_v41 = vpop.f32.mrb[5].mxu1 }
 0x12f   : > { %v795_v42 = vpop.f32.mrb[6].mxu0  ;;  %v923_v43 = vpop.f32.mrb[6].mxu1 }
 0x130   : > { %v796_v44 = vadd.f32 %v2534_v17, %v795_v42  ;;  %v924_v45 = vadd.f32 %v2534_v17, %v923_v43  ;;  %v797_v46 = vpop.f32.mrb[7].mxu0  ;;  %v925_v47 = vpop.f32.mrb[7].mxu1  ;;  %v1041_v48 = vmax.f32 %v793_v38, 0.0  ;;  %v1073_v49 = vmax.f32 %v921_v39, 0.0 }
 0x132   : > { %v1042_v50 = vmax.f32 %v796_v44, 0.0  ;;  %v1074_v51 = vmax.f32 %v924_v45, 0.0 }
 0x134   : > { %v1787_v52 = vpack.c.bf16 %v1042_v50, %v1041_v48  ;;  %v1867_v53 = vpack.c.bf16 %v1074_v51, %v1073_v49 }
 0x135   : > { %v800_v54 = vpop.f32.mrb[8].mxu0  ;;  %v928_v55 = vpop.f32.mrb[8].mxu1 }
 0x136   : > { %1939 = vst [vmem:[%s2543_s5 + $0x8] sm:$0xff] %v1787_v52   ;;  %1955 = vst [vmem:[%s2543_s5 + $0x88] sm:$0xff] %v1867_v53   ;;  %v801_v56 = vadd.f32 %v2534_v17, %v800_v54  ;;  %v929_v57 = vadd.f32 %v2534_v17, %v928_v55  ;;  %v802_v58 = vpop.f32.mrb[9].mxu0  ;;  %v930_v59 = vpop.f32.mrb[9].mxu1 }
 0x137   : > { %v803_v60 = vpop.f32.mrb[10].mxu0  ;;  %v931_v61 = vpop.f32.mrb[10].mxu1 }
 0x138   : > { %v804_v62 = vadd.f32 %v2534_v17, %v803_v60  ;;  %v932_v63 = vadd.f32 %v2534_v17, %v931_v61  ;;  %v805_v0 = vpop.f32.mrb[11].mxu0  ;;  %v933_v1 = vpop.f32.mrb[11].mxu1  ;;  %v1043_v2 = vmax.f32 %v801_v56, 0.0  ;;  %v1075_v3 = vmax.f32 %v929_v57, 0.0 }
 0x13a   : > { %v1044_v4 = vmax.f32 %v804_v62, 0.0  ;;  %v1076_v5 = vmax.f32 %v932_v63, 0.0 }
 0x13c   : > { %v1792_v6 = vpack.c.bf16 %v1044_v4, %v1043_v2  ;;  %v1872_v7 = vpack.c.bf16 %v1076_v5, %v1075_v3 }
 0x13d   : > { %v808_v8 = vpop.f32.mrb[12].mxu0  ;;  %v936_v9 = vpop.f32.mrb[12].mxu1 }
 0x13e   : > { %1940 = vst [vmem:[%s2543_s5 + $0x10] sm:$0xff] %v1792_v6   ;;  %1956 = vst [vmem:[%s2543_s5 + $0x90] sm:$0xff] %v1872_v7   ;;  %v809_v10 = vadd.f32 %v2534_v17, %v808_v8  ;;  %v937_v11 = vadd.f32 %v2534_v17, %v936_v9  ;;  %v810_v12 = vpop.f32.mrb[13].mxu0  ;;  %v938_v13 = vpop.f32.mrb[13].mxu1 }
 0x13f   : > { %v811_v14 = vpop.f32.mrb[14].mxu0  ;;  %v939_v15 = vpop.f32.mrb[14].mxu1 }
 0x140   : > { %v812_v16 = vadd.f32 %v2534_v17, %v811_v14  ;;  %v940_v18 = vadd.f32 %v2534_v17, %v939_v15  ;;  %v813_v19 = vpop.f32.mrb[15].mxu0  ;;  %v941_v20 = vpop.f32.mrb[15].mxu1  ;;  %v1045_v21 = vmax.f32 %v809_v10, 0.0  ;;  %v1077_v22 = vmax.f32 %v937_v11, 0.0 }
 0x142   : > { %v1046_v23 = vmax.f32 %v812_v16, 0.0  ;;  %v1078_v24 = vmax.f32 %v940_v18, 0.0 }
 0x144   : > { %v1797_v25 = vpack.c.bf16 %v1046_v23, %v1045_v21  ;;  %v1877_v26 = vpack.c.bf16 %v1078_v24, %v1077_v22 }
 0x145   : > { %v816_v27 = vpop.f32.mrb[16].mxu0  ;;  %v944_v28 = vpop.f32.mrb[16].mxu1 }
 0x146   : > { %1941 = vst [vmem:[%s2543_s5 + $0x18] sm:$0xff] %v1797_v25   ;;  %1957 = vst [vmem:[%s2543_s5 + $0x98] sm:$0xff] %v1877_v26   ;;  %v817_v29 = vadd.f32 %v2534_v17, %v816_v27  ;;  %v945_v30 = vadd.f32 %v2534_v17, %v944_v28  ;;  %v818_v31 = vpop.f32.mrb[17].mxu0  ;;  %v946_v32 = vpop.f32.mrb[17].mxu1 }
 0x147   : > { %v819_v33 = vpop.f32.mrb[18].mxu0  ;;  %v947_v34 = vpop.f32.mrb[18].mxu1 }
 0x148   : > { %v820_v35 = vadd.f32 %v2534_v17, %v819_v33  ;;  %v948_v36 = vadd.f32 %v2534_v17, %v947_v34  ;;  %v821_v37 = vpop.f32.mrb[19].mxu0  ;;  %v949_v38 = vpop.f32.mrb[19].mxu1  ;;  %v1047_v39 = vmax.f32 %v817_v29, 0.0  ;;  %v1079_v40 = vmax.f32 %v945_v30, 0.0 }
 0x14a   : > { %v1048_v41 = vmax.f32 %v820_v35, 0.0  ;;  %v1080_v42 = vmax.f32 %v948_v36, 0.0 }
 0x14c   : > { %v1802_v43 = vpack.c.bf16 %v1048_v41, %v1047_v39  ;;  %v1882_v44 = vpack.c.bf16 %v1080_v42, %v1079_v40 }
 0x14d   : > { %v824_v45 = vpop.f32.mrb[20].mxu0  ;;  %v952_v46 = vpop.f32.mrb[20].mxu1 }
 0x14e   : > { %1942 = vst [vmem:[%s2543_s5 + $0x20] sm:$0xff] %v1802_v43   ;;  %1958 = vst [vmem:[%s2543_s5 + $0xa0] sm:$0xff] %v1882_v44   ;;  %v825_v47 = vadd.f32 %v2534_v17, %v824_v45  ;;  %v953_v48 = vadd.f32 %v2534_v17, %v952_v46  ;;  %v826_v49 = vpop.f32.mrb[21].mxu0  ;;  %v954_v50 = vpop.f32.mrb[21].mxu1 }
 0x14f   : > { %v827_v51 = vpop.f32.mrb[22].mxu0  ;;  %v955_v52 = vpop.f32.mrb[22].mxu1 }
 0x150   : > { %v828_v53 = vadd.f32 %v2534_v17, %v827_v51  ;;  %v956_v54 = vadd.f32 %v2534_v17, %v955_v52  ;;  %v829_v55 = vpop.f32.mrb[23].mxu0  ;;  %v957_v56 = vpop.f32.mrb[23].mxu1  ;;  %v1049_v57 = vmax.f32 %v825_v47, 0.0  ;;  %v1081_v58 = vmax.f32 %v953_v48, 0.0 }
 0x152   : > { %v1050_v59 = vmax.f32 %v828_v53, 0.0  ;;  %v1082_v60 = vmax.f32 %v956_v54, 0.0 }
 0x154   : > { %v1807_v61 = vpack.c.bf16 %v1050_v59, %v1049_v57  ;;  %v1887_v62 = vpack.c.bf16 %v1082_v60, %v1081_v58 }
 0x155   : > { %v832_v63 = vpop.f32.mrb[24].mxu0  ;;  %v960_v0 = vpop.f32.mrb[24].mxu1 }
 0x156   : > { %1943 = vst [vmem:[%s2543_s5 + $0x28] sm:$0xff] %v1807_v61   ;;  %1959 = vst [vmem:[%s2543_s5 + $0xa8] sm:$0xff] %v1887_v62   ;;  %v833_v1 = vadd.f32 %v2534_v17, %v832_v63  ;;  %v961_v2 = vadd.f32 %v2534_v17, %v960_v0  ;;  %v834_v3 = vpop.f32.mrb[25].mxu0  ;;  %v962_v4 = vpop.f32.mrb[25].mxu1 }
 0x157   : > { %v835_v5 = vpop.f32.mrb[26].mxu0  ;;  %v963_v6 = vpop.f32.mrb[26].mxu1 }
 0x158   : > { %v836_v7 = vadd.f32 %v2534_v17, %v835_v5  ;;  %v964_v8 = vadd.f32 %v2534_v17, %v963_v6  ;;  %v837_v9 = vpop.f32.mrb[27].mxu0  ;;  %v965_v10 = vpop.f32.mrb[27].mxu1  ;;  %v1051_v11 = vmax.f32 %v833_v1, 0.0  ;;  %v1083_v12 = vmax.f32 %v961_v2, 0.0 }
 0x15a   : > { %v1052_v13 = vmax.f32 %v836_v7, 0.0  ;;  %v1084_v14 = vmax.f32 %v964_v8, 0.0 }
 0x15c   : > { %v1812_v15 = vpack.c.bf16 %v1052_v13, %v1051_v11  ;;  %v1892_v16 = vpack.c.bf16 %v1084_v14, %v1083_v12 }
 0x15d   : > { %v840_v18 = vpop.f32.mrb[28].mxu0  ;;  %v968_v19 = vpop.f32.mrb[28].mxu1 }
 0x15e   : > { %1944 = vst [vmem:[%s2543_s5 + $0x30] sm:$0xff] %v1812_v15   ;;  %1960 = vst [vmem:[%s2543_s5 + $0xb0] sm:$0xff] %v1892_v16   ;;  %v841_v20 = vadd.f32 %v2534_v17, %v840_v18  ;;  %v969_v21 = vadd.f32 %v2534_v17, %v968_v19  ;;  %v842_v22 = vpop.f32.mrb[29].mxu0  ;;  %v970_v23 = vpop.f32.mrb[29].mxu1 }
 0x15f   : > { %v843_v24 = vpop.f32.mrb[30].mxu0  ;;  %v971_v25 = vpop.f32.mrb[30].mxu1 }
 0x160   : > { %v844_v26 = vadd.f32 %v2534_v17, %v843_v24  ;;  %v972_v27 = vadd.f32 %v2534_v17, %v971_v25  ;;  %v845_v28 = vpop.f32.mrb[31].mxu0  ;;  %v973_v29 = vpop.f32.mrb[31].mxu1  ;;  %v1053_v30 = vmax.f32 %v841_v20, 0.0  ;;  %v1085_v31 = vmax.f32 %v969_v21, 0.0 }
 0x162   : > { %v1054_v32 = vmax.f32 %v844_v26, 0.0  ;;  %v1086_v33 = vmax.f32 %v972_v27, 0.0 }
 0x164   : > { %v1817_v34 = vpack.c.bf16 %v1054_v32, %v1053_v30  ;;  %v1897_v35 = vpack.c.bf16 %v1086_v33, %v1085_v31 }
 0x165   : > { %v848_v36 = vpop.f32.mrb[32].mxu0  ;;  %v976_v37 = vpop.f32.mrb[32].mxu1 }
 0x166   : > { %1945 = vst [vmem:[%s2543_s5 + $0x38] sm:$0xff] %v1817_v34   ;;  %1961 = vst [vmem:[%s2543_s5 + $0xb8] sm:$0xff] %v1897_v35   ;;  %v849_v38 = vadd.f32 %v2534_v17, %v848_v36  ;;  %v977_v39 = vadd.f32 %v2534_v17, %v976_v37  ;;  %v850_v40 = vpop.f32.mrb[33].mxu0  ;;  %v978_v41 = vpop.f32.mrb[33].mxu1 }
 0x167   : > { %v851_v42 = vpop.f32.mrb[34].mxu0  ;;  %v979_v43 = vpop.f32.mrb[34].mxu1 }
 0x168   : > { %v852_v44 = vadd.f32 %v2534_v17, %v851_v42  ;;  %v980_v45 = vadd.f32 %v2534_v17, %v979_v43  ;;  %v853_v46 = vpop.f32.mrb[35].mxu0  ;;  %v981_v47 = vpop.f32.mrb[35].mxu1  ;;  %v1055_v48 = vmax.f32 %v849_v38, 0.0  ;;  %v1087_v49 = vmax.f32 %v977_v39, 0.0 }
 0x16a   : > { %v1056_v50 = vmax.f32 %v852_v44, 0.0  ;;  %v1088_v51 = vmax.f32 %v980_v45, 0.0 }
 0x16c   : > { %v1822_v52 = vpack.c.bf16 %v1056_v50, %v1055_v48  ;;  %v1902_v53 = vpack.c.bf16 %v1088_v51, %v1087_v49 }
 0x16d   : > { %v856_v54 = vpop.f32.mrb[36].mxu0  ;;  %v984_v55 = vpop.f32.mrb[36].mxu1 }
 0x16e   : > { %1946 = vst [vmem:[%s2543_s5 + $0x40] sm:$0xff] %v1822_v52   ;;  %1962 = vst [vmem:[%s2543_s5 + $0xc0] sm:$0xff] %v1902_v53   ;;  %v857_v56 = vadd.f32 %v2534_v17, %v856_v54  ;;  %v985_v57 = vadd.f32 %v2534_v17, %v984_v55  ;;  %v858_v58 = vpop.f32.mrb[37].mxu0  ;;  %v986_v59 = vpop.f32.mrb[37].mxu1 }
 0x16f   : > { %v859_v60 = vpop.f32.mrb[38].mxu0  ;;  %v987_v61 = vpop.f32.mrb[38].mxu1 }
 0x170   : > { %v860_v62 = vadd.f32 %v2534_v17, %v859_v60  ;;  %v988_v63 = vadd.f32 %v2534_v17, %v987_v61  ;;  %v861_v0 = vpop.f32.mrb[39].mxu0  ;;  %v989_v1 = vpop.f32.mrb[39].mxu1  ;;  %v1057_v2 = vmax.f32 %v857_v56, 0.0  ;;  %v1089_v3 = vmax.f32 %v985_v57, 0.0 }
 0x172   : > { %v1058_v4 = vmax.f32 %v860_v62, 0.0  ;;  %v1090_v5 = vmax.f32 %v988_v63, 0.0 }
 0x174   : > { %v1827_v6 = vpack.c.bf16 %v1058_v4, %v1057_v2  ;;  %v1907_v7 = vpack.c.bf16 %v1090_v5, %v1089_v3 }
 0x175   : > { %v864_v8 = vpop.f32.mrb[40].mxu0  ;;  %v992_v9 = vpop.f32.mrb[40].mxu1 }
 0x176   : > { %1947 = vst [vmem:[%s2543_s5 + $0x48] sm:$0xff] %v1827_v6   ;;  %1963 = vst [vmem:[%s2543_s5 + $0xc8] sm:$0xff] %v1907_v7   ;;  %v865_v10 = vadd.f32 %v2534_v17, %v864_v8  ;;  %v993_v11 = vadd.f32 %v2534_v17, %v992_v9  ;;  %v866_v12 = vpop.f32.mrb[41].mxu0  ;;  %v994_v13 = vpop.f32.mrb[41].mxu1 }
 0x177   : > { %v867_v14 = vpop.f32.mrb[42].mxu0  ;;  %v995_v15 = vpop.f32.mrb[42].mxu1 }
 0x178   : > { %v868_v16 = vadd.f32 %v2534_v17, %v867_v14  ;;  %v996_v18 = vadd.f32 %v2534_v17, %v995_v15  ;;  %v869_v19 = vpop.f32.mrb[43].mxu0  ;;  %v997_v20 = vpop.f32.mrb[43].mxu1  ;;  %v1059_v21 = vmax.f32 %v865_v10, 0.0  ;;  %v1091_v22 = vmax.f32 %v993_v11, 0.0 }
 0x17a   : > { %v1060_v23 = vmax.f32 %v868_v16, 0.0  ;;  %v1092_v24 = vmax.f32 %v996_v18, 0.0 }
 0x17c   : > { %v1832_v25 = vpack.c.bf16 %v1060_v23, %v1059_v21  ;;  %v1912_v26 = vpack.c.bf16 %v1092_v24, %v1091_v22 }
 0x17d   : > { %v872_v27 = vpop.f32.mrb[44].mxu0  ;;  %v1000_v28 = vpop.f32.mrb[44].mxu1 }
 0x17e   : > { %1948 = vst [vmem:[%s2543_s5 + $0x50] sm:$0xff] %v1832_v25   ;;  %1964 = vst [vmem:[%s2543_s5 + $0xd0] sm:$0xff] %v1912_v26   ;;  %v873_v29 = vadd.f32 %v2534_v17, %v872_v27  ;;  %v1001_v30 = vadd.f32 %v2534_v17, %v1000_v28  ;;  %v874_v31 = vpop.f32.mrb[45].mxu0  ;;  %v1002_v32 = vpop.f32.mrb[45].mxu1 }
 0x17f   : > { %v875_v33 = vpop.f32.mrb[46].mxu0  ;;  %v1003_v34 = vpop.f32.mrb[46].mxu1 }
 0x180   : > { %v876_v35 = vadd.f32 %v2534_v17, %v875_v33  ;;  %v1004_v36 = vadd.f32 %v2534_v17, %v1003_v34  ;;  %v877_v37 = vpop.f32.mrb[47].mxu0  ;;  %v1005_v38 = vpop.f32.mrb[47].mxu1  ;;  %v1061_v39 = vmax.f32 %v873_v29, 0.0  ;;  %v1093_v40 = vmax.f32 %v1001_v30, 0.0 }
 0x182   : > { %v1062_v41 = vmax.f32 %v876_v35, 0.0  ;;  %v1094_v42 = vmax.f32 %v1004_v36, 0.0 }
 0x184   : > { %v1837_v43 = vpack.c.bf16 %v1062_v41, %v1061_v39  ;;  %v1917_v44 = vpack.c.bf16 %v1094_v42, %v1093_v40 }
 0x185   : > { %v880_v45 = vpop.f32.mrb[48].mxu0  ;;  %v1008_v46 = vpop.f32.mrb[48].mxu1 }
 0x186   : > { %1949 = vst [vmem:[%s2543_s5 + $0x58] sm:$0xff] %v1837_v43   ;;  %1965 = vst [vmem:[%s2543_s5 + $0xd8] sm:$0xff] %v1917_v44   ;;  %v881_v47 = vadd.f32 %v2534_v17, %v880_v45  ;;  %v1009_v48 = vadd.f32 %v2534_v17, %v1008_v46  ;;  %v882_v49 = vpop.f32.mrb[49].mxu0  ;;  %v1010_v50 = vpop.f32.mrb[49].mxu1 }
 0x187   : > { %v883_v51 = vpop.f32.mrb[50].mxu0  ;;  %v1011_v52 = vpop.f32.mrb[50].mxu1 }
 0x188   : > { %v884_v53 = vadd.f32 %v2534_v17, %v883_v51  ;;  %v1012_v54 = vadd.f32 %v2534_v17, %v1011_v52  ;;  %v885_v55 = vpop.f32.mrb[51].mxu0  ;;  %v1013_v56 = vpop.f32.mrb[51].mxu1  ;;  %v1063_v57 = vmax.f32 %v881_v47, 0.0  ;;  %v1095_v58 = vmax.f32 %v1009_v48, 0.0 }
 0x18a   : > { %v1064_v59 = vmax.f32 %v884_v53, 0.0  ;;  %v1096_v60 = vmax.f32 %v1012_v54, 0.0 }
 0x18c   : > { %v1842_v61 = vpack.c.bf16 %v1064_v59, %v1063_v57  ;;  %v1922_v62 = vpack.c.bf16 %v1096_v60, %v1095_v58 }
 0x18d   : > { %v888_v63 = vpop.f32.mrb[52].mxu0  ;;  %v1016_v0 = vpop.f32.mrb[52].mxu1 }
 0x18e   : > { %1950 = vst [vmem:[%s2543_s5 + $0x60] sm:$0xff] %v1842_v61   ;;  %1966 = vst [vmem:[%s2543_s5 + $0xe0] sm:$0xff] %v1922_v62   ;;  %v889_v1 = vadd.f32 %v2534_v17, %v888_v63  ;;  %v1017_v2 = vadd.f32 %v2534_v17, %v1016_v0  ;;  %v890_v3 = vpop.f32.mrb[53].mxu0  ;;  %v1018_v4 = vpop.f32.mrb[53].mxu1 }
 0x18f   : > { %v891_v5 = vpop.f32.mrb[54].mxu0  ;;  %v1019_v6 = vpop.f32.mrb[54].mxu1 }
 0x190   : > { %v892_v7 = vadd.f32 %v2534_v17, %v891_v5  ;;  %v1020_v8 = vadd.f32 %v2534_v17, %v1019_v6  ;;  %v893_v9 = vpop.f32.mrb[55].mxu0  ;;  %v1021_v10 = vpop.f32.mrb[55].mxu1  ;;  %v1065_v11 = vmax.f32 %v889_v1, 0.0  ;;  %v1097_v12 = vmax.f32 %v1017_v2, 0.0 }
 0x192   : > { %v1066_v13 = vmax.f32 %v892_v7, 0.0  ;;  %v1098_v14 = vmax.f32 %v1020_v8, 0.0 }
 0x194   : > { %v1847_v15 = vpack.c.bf16 %v1066_v13, %v1065_v11  ;;  %v1927_v16 = vpack.c.bf16 %v1098_v14, %v1097_v12 }
 0x195   : > { %v896_v18 = vpop.f32.mrb[56].mxu0  ;;  %v1024_v19 = vpop.f32.mrb[56].mxu1 }
 0x196   : > { %1951 = vst [vmem:[%s2543_s5 + $0x68] sm:$0xff] %v1847_v15   ;;  %1967 = vst [vmem:[%s2543_s5 + $0xe8] sm:$0xff] %v1927_v16   ;;  %v897_v20 = vadd.f32 %v2534_v17, %v896_v18  ;;  %v1025_v21 = vadd.f32 %v2534_v17, %v1024_v19  ;;  %v898_v22 = vpop.f32.mrb[57].mxu0  ;;  %v1026_v23 = vpop.f32.mrb[57].mxu1 }
 0x197   : > { %v899_v24 = vpop.f32.mrb[58].mxu0  ;;  %v1027_v25 = vpop.f32.mrb[58].mxu1 }
 0x198   : > { %v900_v26 = vadd.f32 %v2534_v17, %v899_v24  ;;  %v1028_v27 = vadd.f32 %v2534_v17, %v1027_v25  ;;  %v901_v28 = vpop.f32.mrb[59].mxu0  ;;  %v1029_v29 = vpop.f32.mrb[59].mxu1  ;;  %v1067_v30 = vmax.f32 %v897_v20, 0.0  ;;  %v1099_v31 = vmax.f32 %v1025_v21, 0.0 }
 0x19a   : > { %v1068_v32 = vmax.f32 %v900_v26, 0.0  ;;  %v1100_v33 = vmax.f32 %v1028_v27, 0.0 }
 0x19c   : > { %v1852_v34 = vpack.c.bf16 %v1068_v32, %v1067_v30  ;;  %v1932_v35 = vpack.c.bf16 %v1100_v33, %v1099_v31 }
 0x19d   : > { %v904_v36 = vpop.f32.mrb[60].mxu0  ;;  %v1032_v37 = vpop.f32.mrb[60].mxu1 }
 0x19e   : > { %1952 = vst [vmem:[%s2543_s5 + $0x70] sm:$0xff] %v1852_v34   ;;  %1968 = vst [vmem:[%s2543_s5 + $0xf0] sm:$0xff] %v1932_v35   ;;  %v905_v38 = vadd.f32 %v2534_v17, %v904_v36  ;;  %v1033_v39 = vadd.f32 %v2534_v17, %v1032_v37  ;;  %v906_v40 = vpop.f32.mrb[61].mxu0  ;;  %v1034_v41 = vpop.f32.mrb[61].mxu1 }
 0x19f   : > { %v907_v42 = vpop.f32.mrb[62].mxu0  ;;  %v1035_v43 = vpop.f32.mrb[62].mxu1 }
 0x1a0   : > { %v908_v44 = vadd.f32 %v2534_v17, %v907_v42  ;;  %v1036_v45 = vadd.f32 %v2534_v17, %v1035_v43  ;;  %v909_v46 = vpop.f32.mrb[63].mxu0  ;;  %v1037_v47 = vpop.f32.mrb[63].mxu1  ;;  %v1069_v48 = vmax.f32 %v905_v38, 0.0  ;;  %v1101_v49 = vmax.f32 %v1033_v39, 0.0 }
 0x1a2   : > { %v1070_v50 = vmax.f32 %v908_v44, 0.0  ;;  %v1102_v51 = vmax.f32 %v1036_v45, 0.0 }
 0x1a4   : > { %v1857_v17 = vpack.c.bf16 %v1070_v50, %v1069_v48  ;;  %v1937_v52 = vpack.c.bf16 %v1102_v51, %v1101_v49 }
 0x1a6   : > { %1953 = vst [vmem:[%s2543_s5 + $0x78] sm:$0xff] %v1857_v17   ;;  %1969 = vst [vmem:[%s2543_s5 + $0xf8] sm:$0xff] %v1937_v52  }
 0x1a7   : > { %2201 = shalt.err (!%p2198_p6)
}
 0x1a8   : > { %s2202_s4 = scalar_lea.hbm %s2641_s20, 4096  ;;  %s2206_s7 = scalar_lea.hbm %s2704_s3, 16384 }
 0x1a9   : > { %p2203_p7 = scmp.ne.s32.totalorder %s2641_s20, %s2202_s4  ;;  %p2207_p11 = scmp.lt.u32.totalorder %s2641_s20, %s2704_s3 }
 0x1aa   : > { %p2208_p12 = scmp.lt.u32.totalorder %s2206_s7, %s2202_s4  ;;  %p2210_p0 = scmp.lt.u32.totalorder %s2202_s4, %s2641_s20 }
 0x1ab   : > { %p2204_p9 = pnand %p2203_p7, %p2359_p3 }
 0x1ac   : > { %p2209_p13 = por %p2208_p12, %p2207_p11 }
 0x1ad   : > { %p2205_p10 = pneg %p2204_p9 }
 0x1ae   : > { %p2211_p1 = por %p2210_p0, %p2209_p13 }
 0x1b0   : > { %p2212_p2 = pnand %p2211_p1, %p2205_p10 }
 0x1b2   : > { %2215 = shalt.err (!%p2212_p2)
}
 0x1b3   : > { %s2286_s15 = smov 64   ;;  %s2287_s10 = smov 4  }
 0x1b4   : > { %2002 = dma.vmem_to_hbm [thread:$0]  (%p2359_p3), %s2643_s16, 4096, %s2641_s20, %s2649_s21, %s2286_s15, %s2286_s15, %s2287_s10  }
 0x1b5 PF: > { %p2008_p4 = scmp.ge.s32.totalorder %s2282_s19, 2  ;;  %s1455_s11 = sand.u32 1, %s2254_s12  }
 0x1b6   : > { %s1456_s24 = scalar_lea.sflag [#allocation3], %s1455_s11 }
 0x1b7   : > { %p2005_p5 = pnand %p2008_p4, %p2368_p8 }
 0x1b9   : > { %2249 = dma.done.wait (!%p2005_p5), %s1456_s24, 4096  }
 0x1ba   : > { %2251 = vsyncadd (!%p2005_p5), %s1456_s24, 4294963200  ;;  %s16_s19 = sadd.s32 1, %s2282_s19   ;;  %s2707_s12 = smov %s2258_s13 }
 0x1bb   : > { %p13_p6 = scmp.ge.s32.totalorder %s16_s19, 6   ;;  %s2708_s13 = smov %s2262_s14 }
 0x1bc   : > { %s2709_s14 = smov %s2377_s30  ;;  %s2710_s15 = smov %s2274_s17 }
 0x1bd   : > { %s2711_s16 = smov %s2278_s18  ;;  %s2712_s17 = smov %s2715_s22 }
 0x1be   : > { %s2713_s18 = smov %s2719_s23  ;;  %15 = sbr.rel (!%p13_p6) target bundleno = 5 (0x5), region = 74 }
 0x1c5   :  { %1461 = vsyncpa [#allocation3], 1 }
 0x1c6   :  { %1463 = vsyncpa [#allocation3 + $0x1], 1 }

</bundles_post_ra>
